<compile_context>
chip_gen: v6e
topology: v6e:2x2x1
jax: 0.10.0
libtpu: 0.0.40
codegen_flags: <defaults>
</compile_context>

<pallas_src>
import functools

import jax
import jax.numpy as jnp
from jax import lax
from jax.experimental import pallas as pl
from jax.experimental.pallas import tpu as pltpu


def _focal_partials_kernel(logits_ref, targets_ref, alpha_ref, out_ref, *, n_true, tile_n):
    """Per-tile partial sums: out[tile, 0, 0] = sum_ce, out[tile, 0, 1] = sum_at."""
    tile_idx = pl.program_id(0)

    logits = logits_ref[...].astype(jnp.float32)   # (TILE_N, C)  f32 compute on VMEM tile
    targets = targets_ref[...]                     # (TILE_N, 1)  int32
    alpha = alpha_ref[...].astype(jnp.float32)     # (1, C)
    tn, c = logits.shape

    # Mask rows of the last (partial) tile that fall beyond the true batch size.
    row_ids = tile_idx * tile_n + lax.broadcasted_iota(jnp.int32, (tn, 1), 0)
    valid = row_ids < n_true                       # (TILE_N, 1) bool

    # Single bool class-match mask (one-hot of targets, computed once, never cast to f32
    # as a standalone (N, C) array).
    col_ids = lax.broadcasted_iota(jnp.int32, (tn, c), 1)
    cls_mask = (col_ids == targets) & valid        # (TILE_N, C) bool

    # Numerically stable log-sum-exp cross entropy per row (XLU row reductions).
    row_max = jnp.max(logits, axis=-1, keepdims=True)                          # (TILE_N, 1)
    lse = row_max + jnp.log(jnp.sum(jnp.exp(logits - row_max),
                                    axis=-1, keepdims=True))                   # (TILE_N, 1)
    picked = jnp.sum(jnp.where(cls_mask, logits, 0.0), axis=-1, keepdims=True)  # (TILE_N, 1)
    ce_rows = lse - picked                                                      # (TILE_N, 1)
    sum_ce = jnp.sum(jnp.where(valid, ce_rows, 0.0))                            # scalar

    # alpha gathered at the target class, summed over valid rows:
    # per-class hit counts dotted with the resident (1, C) alpha row.
    counts = jnp.sum(cls_mask.astype(jnp.float32), axis=0, keepdims=True)       # (1, C)
    sum_at = jnp.sum(counts * alpha)                                            # scalar

    # Lane-dense (1, 8, 128) output block; partials live at [0, 0, 0] and [0, 0, 1].
    sub = lax.broadcasted_iota(jnp.int32, (1, 8, 128), 1)
    lane = lax.broadcasted_iota(jnp.int32, (1, 8, 128), 2)
    blk = jnp.zeros((1, 8, 128), jnp.float32)
    blk = jnp.where((sub == 0) & (lane == 0), sum_ce, blk)
    blk = jnp.where((sub == 0) & (lane == 1), sum_at, blk)
    out_ref[...] = blk


def weighted_focal_loss(logits, targets, alpha, gamma=2, tile_n=None):
    """logits: (N, C) float (any dtype, e.g. bf16), targets: (N,) int, alpha: (C,) float."""
    n, c = logits.shape

    # Tile size: multiple of 16 sublanes (valid for f32 and bf16 blocks), capped so
    # double-buffered tiles comfortably fit v7x's 64 MiB physical / scoped VMEM.
    if tile_n is None:
        tile_n = min(512, n)
    tile_n = max(16, ((tile_n + 15) // 16) * 16)
    num_tiles = pl.cdiv(n, tile_n)

    targets_2d = targets.astype(jnp.int32).reshape(n, 1)
    alpha_2d = alpha.astype(jnp.float32).reshape(1, c)

    partials = pl.pallas_call(
        functools.partial(_focal_partials_kernel, n_true=n, tile_n=tile_n),
        out_shape=jax.ShapeDtypeStruct((num_tiles, 8, 128), jnp.float32),
        grid=(num_tiles,),
        in_specs=[
            pl.BlockSpec((tile_n, c), lambda i: (i, 0)),   # logits tile (native dtype)
            pl.BlockSpec((tile_n, 1), lambda i: (i, 0)),   # targets tile
            pl.BlockSpec((1, c), lambda i: (0, 0)),        # alpha: constant index -> resident
        ],
        out_specs=pl.BlockSpec((1, 8, 128), lambda i: (i, 0, 0)),
        compiler_params=pltpu.CompilerParams(
            dimension_semantics=("parallel",),             # tiles independent -> both TCs on v7x
            vmem_limit_bytes=48 * 1024 * 1024,             # raise v5e's 16 MiB default, safe on v7x
        ),
    )(logits, targets_2d, alpha_2d)

    # Tiny scalar finalize in plain JAX (divide by the TRUE N, not the tile size).
    n_f = jnp.float32(n)
    ce = jnp.sum(partials[:, 0, 0]) / n_f           # mean cross entropy
    mean_at = jnp.sum(partials[:, 0, 1]) / n_f      # mean alpha[target]
    pt = jnp.exp(-ce)
    # clamp guards fractional gamma with ce ~ 0 (pt -> 1); no-op for the default gamma=2
    focal_factor = jnp.maximum(1.0 - pt, 0.0) ** gamma * ce
    # mean_i(at_i * factor) == mean_i(at_i) * factor since factor is a batch-level scalar
    return mean_at * focal_factor


def weighted_focal_loss_ref(logits, targets, alpha, gamma=2):
    """Pure-JAX reference mirroring the PyTorch module exactly."""
    logits = logits.astype(jnp.float32)
    logp = jax.nn.log_softmax(logits, axis=-1)
    ce_per = -jnp.take_along_axis(logp, targets[:, None].astype(jnp.int32), axis=-1)[:, 0]
    ce = jnp.mean(ce_per)                       # nn.CrossEntropyLoss default mean reduction
    at = alpha.astype(jnp.float32)[targets.astype(jnp.int32)]
    pt = jnp.exp(-ce)
    f_loss = at * (1.0 - pt) ** gamma * ce
    return jnp.mean(f_loss)


if __name__ == "__main__":
    # Small synthetic problem: 20 samples, 16 classes.  tile_n=16 -> grid of 2 tiles
    # with a partial last tile, exercising the row-masking path.
    N, C = 20, 16
    key = jax.random.PRNGKey(0)
    k1, k2, k3 = jax.random.split(key, 3)

    logits = jax.random.normal(k1, (N, C), dtype=jnp.float32)
    targets = jax.random.randint(k2, (N,), 0, C, dtype=jnp.int32)
    alpha = jax.random.uniform(k3, (C,), dtype=jnp.float32, minval=0.1, maxval=1.0)

    out = jax.block_until_ready(weighted_focal_loss(logits, targets, alpha, gamma=2, tile_n=16))
    ref = jax.block_until_ready(weighted_focal_loss_ref(logits, targets, alpha, gamma=2))
    assert jnp.allclose(out, ref, rtol=1e-5, atol=1e-6), (out, ref)

    # bf16 logits passed natively (no wrapper-side f32 cast / extra HBM pass).
    logits_bf16 = logits.astype(jnp.bfloat16)
    out_bf = jax.block_until_ready(
        weighted_focal_loss(logits_bf16, targets, alpha, gamma=2, tile_n=16))
    ref_bf = jax.block_until_ready(weighted_focal_loss_ref(logits_bf16, targets, alpha, gamma=2))
    assert jnp.allclose(out_bf, ref_bf, rtol=1e-4, atol=1e-5), (out_bf, ref_bf)

    print("KERNEL_OK")
</pallas_src>

<mosaic_0001>
module attributes {stable_mosaic.version = 11 : i64} {
  func.func @_focal_partials_kernel(%arg0: i32, %arg1: memref<16x16xf32, #tpu.memory_space<vmem>>, %arg2: memref<16x1xi32, #tpu.memory_space<vmem>>, %arg3: memref<1x16xf32, #tpu.memory_space<vmem>>, %arg4: memref<1x8x128xf32, #tpu.memory_space<vmem>>) attributes {dimension_semantics = [#tpu.dimension_semantics<parallel>], iteration_bounds = array<i64: 2>, scalar_prefetch = 0 : i64, scratch_operands = 0 : i64, tpu.core_type = #tpu.core_type<tc>, window_params = [{transform_indices = @transform_0, window_bounds = array<i64: 16, 16>}, {transform_indices = @transform_1, window_bounds = array<i64: 16, 1>}, {pipeline_mode = #tpu.pipeline_mode<synchronous>, transform_indices = @transform_2, window_bounds = array<i64: 1, 16>}, {transform_indices = @transform_3, window_bounds = array<i64: 1, 8, 128>}]} {
    %c0 = arith.constant 0 : index
    %c0_0 = arith.constant 0 : index
    %0 = vector.load %arg1[%c0, %c0_0] : memref<16x16xf32, #tpu.memory_space<vmem>>, vector<16x16xf32>
    %c0_1 = arith.constant 0 : index
    %c0_2 = arith.constant 0 : index
    %1 = vector.load %arg2[%c0_1, %c0_2] : memref<16x1xi32, #tpu.memory_space<vmem>>, vector<16x1xi32>
    %c0_3 = arith.constant 0 : index
    %c0_4 = arith.constant 0 : index
    %2 = vector.load %arg3[%c0_3, %c0_4] : memref<1x16xf32, #tpu.memory_space<vmem>>, vector<1x16xf32>
    %c16_i32 = arith.constant 16 : i32
    %3 = arith.muli %arg0, %c16_i32 : i32
    %4 = tpu.iota {dimensions = array<i32: 0>} : vector<16x1xi32>
    %5 = vector.broadcast %3 : i32 to vector<16x1xi32>
    %6 = arith.addi %5, %4 : vector<16x1xi32>
    %c20_i32 = arith.constant 20 : i32
    %7 = vector.broadcast %c20_i32 : i32 to vector<16x1xi32>
    %8 = arith.cmpi slt, %6, %7 : vector<16x1xi32>
    %9 = tpu.iota {dimensions = array<i32: 1>} : vector<16x16xi32>
    %10 = vector.broadcast %1 : vector<16x1xi32> to vector<16x16xi32>
    %11 = arith.cmpi eq, %9, %10 : vector<16x16xi32>
    %12 = vector.broadcast %8 : vector<16x1xi1> to vector<16x16xi1>
    %13 = arith.andi %11, %12 : vector<16x16xi1>
    %cst = arith.constant dense<0xFF800000> : vector<16xf32>
    %14 = vector.multi_reduction <maximumf>, %0, %cst [1] : vector<16x16xf32> to vector<16xf32>
    %15 = vector.shape_cast %14 : vector<16xf32> to vector<16x1xf32>
    %16 = vector.broadcast %15 : vector<16x1xf32> to vector<16x16xf32>
    %17 = arith.subf %0, %16 : vector<16x16xf32>
    %18 = math.exp %17 : vector<16x16xf32>
    %cst_5 = arith.constant dense<0.000000e+00> : vector<16xf32>
    %19 = vector.multi_reduction <add>, %18, %cst_5 [1] : vector<16x16xf32> to vector<16xf32>
    %20 = vector.shape_cast %19 : vector<16xf32> to vector<16x1xf32>
    %21 = math.log %20 : vector<16x1xf32>
    %22 = arith.addf %15, %21 : vector<16x1xf32>
    %cst_6 = arith.constant 0.000000e+00 : f32
    %23 = vector.broadcast %cst_6 : f32 to vector<16x16xf32>
    %24 = arith.select %13, %0, %23 : vector<16x16xi1>, vector<16x16xf32>
    %cst_7 = arith.constant dense<0.000000e+00> : vector<16xf32>
    %25 = vector.multi_reduction <add>, %24, %cst_7 [1] : vector<16x16xf32> to vector<16xf32>
    %26 = vector.shape_cast %25 : vector<16xf32> to vector<16x1xf32>
    %27 = arith.subf %22, %26 : vector<16x1xf32>
    %cst_8 = arith.constant 0.000000e+00 : f32
    %28 = vector.broadcast %cst_8 : f32 to vector<16x1xf32>
    %29 = arith.select %8, %27, %28 : vector<16x1xi1>, vector<16x1xf32>
    %30 = vector.shape_cast %29 : vector<16x1xf32> to vector<1x16x1xf32>
    %cst_9 = arith.constant dense<0.000000e+00> : vector<1xf32>
    %31 = vector.multi_reduction <add>, %30, %cst_9 [1, 2] : vector<1x16x1xf32> to vector<1xf32>
    %32 = vector.shape_cast %31 : vector<1xf32> to vector<1x1x1xf32>
    %33 = vector.extract %32[0, 0, 0] : f32 from vector<1x1x1xf32>
    %34 = arith.extui %13 : vector<16x16xi1> to vector<16x16xi32>
    %35 = arith.sitofp %34 : vector<16x16xi32> to vector<16x16xf32>
    %cst_10 = arith.constant dense<0.000000e+00> : vector<16xf32>
    %36 = vector.multi_reduction <add>, %35, %cst_10 [0] : vector<16x16xf32> to vector<16xf32>
    %37 = vector.shape_cast %36 : vector<16xf32> to vector<1x16xf32>
    %38 = arith.mulf %37, %2 : vector<1x16xf32>
    %39 = vector.shape_cast %38 : vector<1x16xf32> to vector<1x1x16xf32>
    %cst_11 = arith.constant dense<0.000000e+00> : vector<1xf32>
    %40 = vector.multi_reduction <add>, %39, %cst_11 [1, 2] : vector<1x1x16xf32> to vector<1xf32>
    %41 = vector.shape_cast %40 : vector<1xf32> to vector<1x1x1xf32>
    %42 = vector.extract %41[0, 0, 0] : f32 from vector<1x1x1xf32>
    %43 = tpu.iota {dimensions = array<i32: 1>} : vector<1x8x128xi32>
    %44 = tpu.iota {dimensions = array<i32: 2>} : vector<1x8x128xi32>
    %cst_12 = arith.constant 0.000000e+00 : f32
    %45 = vector.broadcast %cst_12 : f32 to vector<1x8x128xf32>
    %c0_i32 = arith.constant 0 : i32
    %46 = vector.broadcast %c0_i32 : i32 to vector<1x8x128xi32>
    %47 = arith.cmpi eq, %43, %46 : vector<1x8x128xi32>
    %c0_i32_13 = arith.constant 0 : i32
    %48 = vector.broadcast %c0_i32_13 : i32 to vector<1x8x128xi32>
    %49 = arith.cmpi eq, %44, %48 : vector<1x8x128xi32>
    %50 = arith.andi %47, %49 : vector<1x8x128xi1>
    %51 = vector.broadcast %33 : f32 to vector<1x8x128xf32>
    %52 = arith.select %50, %51, %45 : vector<1x8x128xi1>, vector<1x8x128xf32>
    %c0_i32_14 = arith.constant 0 : i32
    %53 = vector.broadcast %c0_i32_14 : i32 to vector<1x8x128xi32>
    %54 = arith.cmpi eq, %43, %53 : vector<1x8x128xi32>
    %c1_i32 = arith.constant 1 : i32
    %55 = vector.broadcast %c1_i32 : i32 to vector<1x8x128xi32>
    %56 = arith.cmpi eq, %44, %55 : vector<1x8x128xi32>
    %57 = arith.andi %54, %56 : vector<1x8x128xi1>
    %58 = vector.broadcast %42 : f32 to vector<1x8x128xf32>
    %59 = arith.select %57, %58, %52 : vector<1x8x128xi1>, vector<1x8x128xf32>
    %c0_15 = arith.constant 0 : index
    %c0_16 = arith.constant 0 : index
    %c0_17 = arith.constant 0 : index
    %60 = vector.load %arg4[%c0_15, %c0_16, %c0_17] : memref<1x8x128xf32, #tpu.memory_space<vmem>>, vector<1x8x128xf32>
    tpu.vector_store %arg4[%c0_15, %c0_16, %c0_17], %59 {strides = array<i32>} : memref<1x8x128xf32, #tpu.memory_space<vmem>>, vector<1x8x128xf32>,
    return
  }
  func.func @transform_0(%arg0: i32) -> (i32, i32) {
    %c0_i32 = arith.constant 0 : i32
    %c0_i32_0 = arith.constant 0 : i32
    return %arg0, %c0_i32 : i32, i32
  }
  func.func @transform_1(%arg0: i32) -> (i32, i32) {
    %c0_i32 = arith.constant 0 : i32
    %c0_i32_0 = arith.constant 0 : i32
    return %arg0, %c0_i32 : i32, i32
  }
  func.func @transform_2(%arg0: i32) -> (i32, i32) {
    %c0_i32 = arith.constant 0 : i32
    %c0_i32_0 = arith.constant 0 : i32
    %c0_i32_1 = arith.constant 0 : i32
    return %c0_i32, %c0_i32_0 : i32, i32
  }
  func.func @transform_3(%arg0: i32) -> (i32, i32, i32) {
    %c0_i32 = arith.constant 0 : i32
    %c0_i32_0 = arith.constant 0 : i32
    %c0_i32_1 = arith.constant 0 : i32
    return %arg0, %c0_i32, %c0_i32_0 : i32, i32, i32
  }
}

</mosaic_0001>

<bundles_post_ra>
// kernel: tpu_custom_call.1
= control target key start
LH: loop header
LB: loop body
LE: loop exit
PB: predicated region body
PF: predicated region fallthrough
CT: control target
= control target key end

     0   :  { %8 = vsyncpa [#allocation3], 0  ;;  %s727_s0 = inlined_call_operand.vmem [shape: f32[20,16], index: 0, kind: input, shape index: {}]   ;;  %s728_s1 = inlined_call_operand.vmem [shape: s32[20,1], index: 1, kind: input, shape index: {}]   ;;  %s729_s2 = inlined_call_operand.vmem [shape: f32[1,16], index: 2, kind: input, shape index: {}]   ;;  %s730_s3 = inlined_call_operand.hbm [shape: f32[2,8,128], index: 3, kind: output, shape index: {}]  }
   0x1   :  { %10 = vsyncpa [#allocation3 + $0x1], 0  ;;  %s589_s12 = smov 0   ;;  %s591_s13 = smov 0  }
   0x2   :  { %s593_s14 = smov 0   ;;  %s595_s15 = smov 0  }
   0x3 LB: > { %s610_s16 = sadd.s32 4294967295, %s564_s15   ;;  %s433_s17 = sadd.s32 4294967294, %s564_s15   ;;  %s564_s15 = sphi %s595_s15, %s740_s15   ;;  %s560_s14 = sphi %s593_s14, %s739_s14   ;;  %s556_s13 = sphi %s591_s13, %s738_s13   ;;  %s552_s12 = sphi %s589_s12, %s737_s12  }
   0x4   : > { %s614_s18 = sadd.s32 1, %s564_s15   ;;  %s96_s19 = sadd.s32 1, %s560_s14 }
   0x5   : > { %s93_s20 = ssub.s32 %s564_s15, %s614_s18  ;;  %p106_p0 = scmp.ne.s32.totalorder %s560_s14, %s556_s13 }
   0x6   : > { %p94_p1 = scmp.eq.s32.totalorder %s93_s20, 0  ;;  %p107_p2 = scmp.eq.s32.totalorder %s610_s16, 1 }
   0x7   : > { %p112_p3 = scmp.ne.s32.totalorder %s556_s13, %s552_s12  ;;  %p113_p4 = scmp.eq.s32.totalorder %s433_s17, 1 }
   0x8   : > { %s625_s21 = scalar_select %p94_p1, %s560_s14, %s96_s19  }
   0x9   : > { %p627_p5 = por %p107_p2, %p106_p0  ;;  %p631_p6 = por %p113_p4, %p112_p3 }
   0xa   : > { %p436_p7 = scmp.ge.s32.totalorder %s564_s15, 1  ;;  %p168_p8 = scmp.lt.s32.totalorder %s564_s15, 3 }
   0xc   : > { %p169_p9 = pnand %p436_p7, %p168_p8 }
   0xd   : > { %s438_s24 = sshll.u32 (!%p169_p9), %s610_s16, 1  ;;  %s442_s5 = sshll.u32 (!%p169_p9), %s610_s16, 4 }
   0xe   : > { %172 = sbr.rel (%p169_p9) target bundleno = 566 (0x236), region = 32  ;;  %p210_p10 = scmp.lt.s32.totalorder (!%p169_p9), %s438_s24, 2 }
   0xf   : > { %s202_s8 = sand.u32 (!%p169_p9), 1, %s556_s13   ;;  %s446_s11 = sshll.u32 (!%p169_p9), %s610_s16, 7 }
  0x10   : > { %s437_s9 = sshll.u32 (!%p169_p9), %s202_s8, 3  ;;  %s692_s26 = scalar_lea.hbm (!%p169_p9), %s730_s3, %s446_s11 }
  0x11   : > { %s204_s17 = scalar_lea.vmem (!%p169_p9), [#allocation2], %s437_s9  ;;  %s349_s27 = scalar_lea.sflag (!%p169_p9), [#allocation3], %s202_s8 }
  0x12   : > { %s362_s19 = sshll.u32 (!%p169_p9), %s204_s17, 4  ;;  %s568_s16 = smov (!%p169_p9), [#allocation2]   ;;  %s363_s19 = int_to_ptr.vmem [resolvable:$true] %s362_s19 }
  0x13   : > { %v566_v0 = vmov 0   ;;  %s742_s24 = smov (!%p210_p10, %s438_s24), 2  ;;  %vm263_vm0 = vcmask 130048   ;;  %v239_v7 = vlaneseq  ;;  %v242_v9 = vstv %s442_s5  ;;  %v237_v58 = vld [vmem:[%s729_s2] sm:$0x1]  ;;  %s508_s29 = sshll.u32 %s568_s16, 4  ;;  %s509_s29 = int_to_ptr.vmem [resolvable:$false] %s508_s29 }
  0x14   : > { %494 = vset.pattern.permute.xlu1 %v566_v0  ;;  %495 = vset.pattern.permute.xlu0 %v566_v0  ;;  %s439_s25 = sshll.u32 %s742_s24, 3  ;;  %v567_v16 = vmov 0.0   ;;  %vm300_vm7 = vcmask 7168   ;;  %vm327_vm8 = vcmask 122880   ;;  %s510_s30 = scalar_lea.vmem %s509_s29, 256 }
  0x15   : > { %s213_s28 = scalar_lea.vmem %s727_s0, %s439_s25  ;;  %s227_s4 = scalar_lea.vmem %s728_s1, %s439_s25  ;;  %v647_v8 = vshrl.u32 %v239_v7, 7  ;;  %v651_v12 = vand.u32 127, %v239_v7 }
  0x16   : > { %v233_v1 = vld [vmem:[%s213_s28] sm:$0xff]  ;;  %v234_v2 = vld [vmem:[%s213_s28 + $0x8] sm:$0xff]  ;;  %s504_s28 = scalar_lea.vmem %s363_s19, 128  ;;  %p511_p0 = scmp.lt.s32.totalorder %s363_s19, %s509_s29 }
  0x17   : > { %v235_v3 = vld [vmem:[%s227_s4] sm:$0xff]  ;;  %v264_v4 = vsel %vm263_vm0, %v233_v1, -inf  ;;  %v236_v5 = vld [vmem:[%s227_s4 + $0x8] sm:$0xff]  ;;  %v267_v6 = vsel %vm263_vm0, %v234_v2, -inf  ;;  %v243_v10 = vadd.s32 %v242_v9, %v647_v8  ;;  %v241_v11 = vadd.s32 8, %v647_v8  ;;  %p505_p11 = scmp.ne.s32.totalorder %s363_s19, %s504_s28  ;;  %p512_p1 = scmp.lt.s32.totalorder %s510_s30, %s504_s28 }
  0x18   : > { %250 = vperm.xlu1 %494, %v235_v3   ;;  %265 = vmax.xlane.f32.xlu0 %v264_v4  ;;  %vm338_vm9 = vcmp.eq.s32.totalorder %v647_v8, 0  ;;  %vm339_vm10 = vcmp.eq.s32.totalorder %v651_v12, 0  ;;  %vm343_vm11 = vcmp.eq.s32.totalorder %v651_v12, 1 }
  0x19   : > { %vm245_vm1 = vcmp.lt.s32.totalorder %v243_v10, 20  ;;  %v244_v13 = vadd.s32 %v242_v9, %v241_v11  ;;  %vm340_vm12 = vmand %vm338_vm9, %vm339_vm10  ;;  %p506_p12 = pnand %p505_p11, %p627_p5  ;;  %p513_p2 = por %p512_p1, %p511_p0 }
  0x1a   : > { %vm344_vm13 = vmand %vm338_vm9, %vm343_vm11 }
  0x1b   : > { %vm246_vm4 = vcmp.lt.s32.totalorder %v244_v13, 20  ;;  %p507_p13 = pneg %p506_p12 }
  0x1c   : > { %253 = vperm.xlu1 %494, %v236_v5   ;;  %268 = vmax.xlane.f32.xlu0 %v267_v6 }
  0x1d   : > { %p514_p3 = pnand %p513_p2, %p507_p13 }
  0x93   : > { %v251_v14 = vpop.permute.xlu1 %250 }
  0x94   : > { %vm255_vm2 = vcmp.eq.s32.totalorder %v651_v12, %v251_v14 }
  0x95   : > { %vm655_vm3 = vmand %vm255_vm2, %vm245_vm1 }
  0x96   : > { %v443_v17 = vsel %vm655_vm3, 1.0, %v567_v16  ;;  %v288_v31 = vsel %vm655_vm3, %v233_v1, 0.0 }
  0x97   : > { %v254_v18 = vpop.permute.xlu1 %253  ;;  %v317_v19 = vsel %vm263_vm0, %v443_v17, 0.0  ;;  %v290_v33 = vsel %vm263_vm0, %v288_v31, 0.0 }
  0x98   : > { %vm256_vm5 = vcmp.eq.s32.totalorder %v651_v12, %v254_v18 }
  0x99   : > { %vm664_vm6 = vmand %vm256_vm5, %vm246_vm4 }
  0x9a   : > { %v444_v21 = vsel %vm664_vm6, 1.0, %v567_v16  ;;  %v289_v35 = vsel %vm664_vm6, %v234_v2, 0.0 }
  0x9b   : > { %v318_v22 = vsel %vm263_vm0, %v444_v21, 0.0  ;;  %v293_v37 = vsel %vm263_vm0, %v289_v35, 0.0 }
  0x9c   : > { %v319_v23 = vadd.f32 %v318_v22, %v317_v19 }
  0x9e   : > { %v320_v39 = vrot.slane %v319_v23, 4 }
  0xa0   : > { %v321_v41 = vadd.f32 %v320_v39, %v319_v23 }
  0xa1   : > { %v266_v24 = vpop.xlane.xlu0 %265 }
  0xa2   : > { %v270_v25 = vsub.f32 %v233_v1, %v266_v24  ;;  %v322_v42 = vrot.slane %v321_v41, 2 }
  0xa4   : > { %v272_v26 = vmul.f32 1.442695, %v270_v25  ;;  %v323_v46 = vadd.f32 %v322_v42, %v321_v41 }
  0xa5   : > { %v269_v27 = vpop.xlane.xlu0 %268 }
  0xa6   : > { %496 = vpow2.f32 %v272_v26  ;;  %v271_v28 = vsub.f32 %v234_v2, %v269_v27  ;;  %v324_v51 = vrot.slane %v323_v46, 1 }
  0xa8   : > { %v274_v29 = vmul.f32 1.442695, %v271_v28  ;;  %v325_v56 = vadd.f32 %v324_v51, %v323_v46 }
  0xaa   : > { %498 = vpow2.f32 %v274_v29  ;;  %v326_v62 = vmul.f32 %v325_v56, %v237_v58 }
  0xac   : > { %v328_v63 = vsel %vm327_vm8, %v326_v62, 0.0 }
  0xb3   : > { %v497_v30 = vpop.eup %496 }
  0xb4   : > { %v276_v32 = vsel %vm263_vm0, %v497_v30, 0.0 }
  0xb5   : > { %277 = vadd.xlane.f32.xlu0 %v276_v32 }
  0xb7   : > { %v499_v34 = vpop.eup %498 }
  0xb8   : > { %v279_v36 = vsel %vm263_vm0, %v499_v34, 0.0 }
  0xb9   : > { %280 = vadd.xlane.f32.xlu1 %v279_v36  ;;  %291 = vadd.xlane.f32.xlu0 %v290_v33 }
  0xbd   : > { %294 = vadd.xlane.f32.xlu0 %v293_v37 }
 0x13e   : > { %v278_v38 = vpop.xlane.xlu0 %277 }
 0x13f   : > { %500 = vlog2.f32 %v278_v38 }
 0x142   : > { %v281_v40 = vpop.xlane.xlu1 %280  ;;  %v292_v45 = vpop.xlane.xlu0 %291 }
 0x143   : > { %502 = vlog2.f32 %v281_v40 }
 0x146   : > { %v295_v53 = vpop.xlane.xlu0 %294 }
 0x14c   : > { %v501_v43 = vpop.eup %500 }
 0x14d   : > { %v283_v44 = vmul.f32 0.6931472, %v501_v43 }
 0x14f   : > { %v286_v47 = vadd.f32 %v283_v44, %v266_v24 }
 0x150   : > { %v503_v48 = vpop.eup %502 }
 0x151   : > { %v285_v49 = vmul.f32 0.6931472, %v503_v48  ;;  %v296_v50 = vsub.f32 %v286_v47, %v292_v45 }
 0x153   : > { %v287_v52 = vadd.f32 %v285_v49, %v269_v27  ;;  %v298_v54 = vsel %vm245_vm1, %v296_v50, 0.0 }
 0x154   : > { %v301_v59 = vsel %vm300_vm7, %v298_v54, 0.0 }
 0x155   : > { %v297_v55 = vsub.f32 %v287_v52, %v295_v53 }
 0x157   : > { %v299_v57 = vsel %vm246_vm4, %v297_v55, 0.0 }
 0x158   : > { %v302_v60 = vsel %vm300_vm7, %v299_v57, 0.0 }
 0x159   : > { %v303_v61 = vadd.f32 %v302_v60, %v301_v59 }
 0x15b   : > { %304 = vadd.xlane.f32.xlu0 %v303_v61 }
 0x15f   : > { %329 = vadd.xlane.f32.xlu0 %v328_v63 }
 0x1e4   : > { %v305_v0 = vpop.xlane.xlu0 %304 }
 0x1e5   : > { %v306_v1 = vrot.slane %v305_v0, 4 }
 0x1e7   : > { %v307_v2 = vadd.f32 %v306_v1, %v305_v0 }
 0x1e8   : > { %v330_v3 = vpop.xlane.xlu0 %329 }
 0x1e9   : > { %v308_v4 = vrot.slane %v307_v2, 2  ;;  %v331_v5 = vrot.slane %v330_v3, 4 }
 0x1eb   : > { %v332_v6 = vadd.f32 %v331_v5, %v330_v3  ;;  %v309_v7 = vadd.f32 %v308_v4, %v307_v2 }
 0x1ed   : > { %v333_v9 = vrot.slane %v332_v6, 2  ;;  %v310_v10 = vrot.slane %v309_v7, 1 }
 0x1ef   : > { %v334_v11 = vadd.f32 %v333_v9, %v332_v6  ;;  %v311_v13 = vadd.f32 %v310_v10, %v309_v7 }
 0x1f1   : > { %449 = vpush %v311_v13  ;;  %v335_v14 = vrot.slane %v334_v11, 1 }
 0x1f3   : > { %v336_v15 = vadd.f32 %v335_v14, %v334_v11 }
 0x1f5   : > { %451 = vpush %v336_v15 }
 0x222   : > { %s450_s10 = spop %449 }
 0x223   : > { %v341_v16 = vstv %s450_s10 }
 0x224   : > { %v342_v17 = vsel %vm340_vm12, %v341_v16, 0.0 }
 0x226   : > { %s452_s20 = spop %451 }
 0x227   : > { %v345_v18 = vstv %s452_s20 }
 0x228   : > { %v346_v8 = vsel %vm344_vm13, %v345_v18, %v342_v17 }
 0x229   : > { %347 = vst [vmem:[%s204_s17] sm:$0xff] %v346_v8 }
 0x22a   : > { %517 = shalt.err (!%p514_p3)
}
 0x22b   : > { %s518_s4 = scalar_lea.hbm %s692_s26, 128  ;;  %s522_s7 = scalar_lea.hbm %s730_s3, 256 }
 0x22c   : > { %p519_p4 = scmp.ne.s32.totalorder %s692_s26, %s518_s4  ;;  %p523_p9 = scmp.lt.s32.totalorder %s692_s26, %s730_s3 }
 0x22d   : > { %p524_p10 = scmp.lt.s32.totalorder %s522_s7, %s518_s4 }
 0x22e   : > { %p520_p7 = pnand %p519_p4, %p627_p5 }
 0x22f   : > { %p525_p11 = por %p524_p10, %p523_p9 }
 0x230   : > { %p521_p8 = pneg %p520_p7 }
 0x232   : > { %p526_p12 = pnand %p525_p11, %p521_p8 }
 0x234   : > { %529 = shalt.err (!%p526_p12)
}
 0x235   : > { %453 = dma.vmem_to_hbm [thread:$0]  (%p627_p5), %s363_s19, 128, %s692_s26, %s349_s27  }
 0x236 PF: > { %p459_p13 = scmp.ge.s32.totalorder %s564_s15, 2  ;;  %s374_s10 = sand.u32 1, %s552_s12  }
 0x237   : > { %s375_s11 = scalar_lea.sflag [#allocation3], %s374_s10 }
 0x238   : > { %p456_p0 = pnand %p459_p13, %p631_p6 }
 0x23a   : > { %p457_p1 = pneg %p456_p0 }
 0x23c   : > { %547 = dma.done.wait (%p457_p1), %s375_s11, 128  }
 0x23d   : > { %549 = vsyncadd (%p457_p1), %s375_s11, 4294967168  ;;  %p13_p2 = scmp.ge.s32.totalorder %s614_s18, 4   ;;  %s737_s12 = smov %s556_s13 }
 0x23e   : > { %s738_s13 = smov %s560_s14  ;;  %s739_s14 = smov %s625_s21 }
 0x23f   : > { %s740_s15 = smov %s614_s18  ;;  %15 = sbr.rel (!%p13_p2) target bundleno = 3 (0x3), region = 70 }
 0x244   :  { %380 = vsyncpa [#allocation3], 1 }
 0x245   :  { %382 = vsyncpa [#allocation3 + $0x1], 1 }

</bundles_post_ra>
